<compile_context>
chip_gen: v7x
topology: tpu7x:2x2x1
jax: 0.10.0
libtpu: 0.0.40
codegen_flags: <defaults>
</compile_context>

<pallas_src>
import functools
import math

import jax
import jax.numpy as jnp
from jax import lax
from jax.experimental import pallas as pl
from jax.experimental.pallas import tpu as pltpu


def _attn_kernel(q_ref, k_ref, v_ref, o_ref, m_ref, l_ref, qs_ref, *, scale):
    """One (batch, head-block, q-tile) tile, one kv chunk of online softmax.

    q_ref  : [BH, C, Tq]  bf16   (resident across the kv grid axis)
    k_ref  : [BH, C, Tk]  bf16
    v_ref  : [BH, C, Tk]  bf16
    o_ref  : [BH, C, Tq]  f32    output block, used as the accumulator
    m_ref  : [BH, 1, Tq]  f32    running max   (scratch)
    l_ref  : [BH, 1, Tq]  f32    running sum   (scratch)
    qs_ref : [BH, C, Tq]  bf16   pre-scaled q  (scratch, staged at kv == 0)
    """
    kv = pl.program_id(3)
    bh = q_ref.shape[0]

    @pl.when(kv == 0)
    def _init():
        m_ref[...] = jnp.full(m_ref.shape, -jnp.inf, jnp.float32)
        l_ref[...] = jnp.zeros(l_ref.shape, jnp.float32)
        o_ref[...] = jnp.zeros(o_ref.shape, o_ref.dtype)
        # Fold the full softmax scale (1/sqrt(ch)) into q ONCE per tile.  The
        # scale is applied in f32 and stored bf16 for the MXU; in exact math it
        # equals scaling q and k by ch**-0.25 each (the PyTorch formulation).
        qs_ref[...] = (q_ref[...].astype(jnp.float32) * scale).astype(qs_ref.dtype)

    def head_body(h, carry):
        q = qs_ref[h]                                      # [C, Tq] bf16 (pre-scaled)
        k = k_ref[h]                                       # [C, Tk] bf16
        v = v_ref[h]                                       # [C, Tk] bf16

        # s[kv, tq] = sum_c k[c, kv] * q[c, tq]  -- bf16 x bf16 -> f32 on MXU,
        # contracting dim 0 of both operands (no explicit transpose).
        s = lax.dot_general(k, q, (((0,), (0,)), ((), ())),
                            preferred_element_type=jnp.float32)      # [Tk, Tq]

        m_prev = m_ref[h]                                  # [1, Tq]
        l_prev = l_ref[h]                                  # [1, Tq]
        m_cur = jnp.max(s, axis=0, keepdims=True)          # [1, Tq]
        m_new = jnp.maximum(m_prev, m_cur)
        alpha = jnp.exp(m_prev - m_new)                    # [1, Tq]
        p = jnp.exp(s - m_new)                             # [Tk, Tq] f32

        l_ref[h] = alpha * l_prev + jnp.sum(p, axis=0, keepdims=True)
        # a[c, tq] += sum_kv v[c, kv] * p[kv, tq]  -- bf16 MXU, f32 accumulate.
        pv = lax.dot_general(v, p.astype(jnp.bfloat16), (((1,), (0,)), ((), ())),
                             preferred_element_type=jnp.float32)     # [C, Tq]
        o_ref[h] = o_ref[h] * alpha + pv
        m_ref[h] = m_new
        return carry

    lax.fori_loop(0, bh, head_body, 0)

    @pl.when(kv == pl.num_programs(3) - 1)
    def _finalize():
        inv_l = pl.reciprocal(l_ref[...], approx=True)     # [BH, 1, Tq]
        o_ref[...] = o_ref[...] * inv_l


def _vmem_capacity_bytes():
    """Generation-aware VMEM capacity; conservative (v7x-sized) fallback."""
    cap = None
    try:
        info = pltpu.get_tpu_info()
        cap = getattr(info, "vmem_capacity_bytes", None)
    except Exception:
        cap = None
    if not cap:
        cap = 64 * 1024 * 1024
    return int(cap)


def _choose_kv_block(length):
    # k/v chunks must have a lane width that is a multiple of 128 (or be the
    # full sequence).  Prefer 512-wide chunks; avoid 128 (poor DMA rows on v5e).
    if length % 128 != 0 or length <= 512:
        return length
    best = 0
    for cand in range(512, 127, -128):
        if length % cand == 0:
            best = cand
            break
    if best >= 256:
        return best
    return length if length <= 4096 else best


def _choose_q_block(length):
    # Query-time tiling bounds q/out/score VMEM at O(Tq) and adds parallel
    # grid iterations (v7x megacore).  Only tile when the sequence is long.
    if length % 128 != 0 or length <= 1024:
        return length
    for cand in range(1024, 127, -128):
        if length % cand == 0:
            return cand
    return length


def _choose_head_block(n_heads, ch, q_block, kv_block, budget, max_bh):
    """Largest divisor of n_heads (<= max_bh, <= 8) fitting the VMEM budget."""
    best = 1
    for bh in range(1, min(n_heads, max_bh, 8) + 1):
        if n_heads % bh:
            continue
        vmem = (
            2 * bh * ch * q_block * 2        # q input (double-buffered, bf16)
            + bh * ch * q_block * 2          # scaled-q scratch (bf16)
            + 4 * bh * ch * kv_block * 2     # k+v inputs (double-buffered, bf16)
            + 2 * bh * ch * q_block * 4      # output accumulator (double-buf, f32)
            + 2 * bh * 8 * q_block * 4       # m/l scratch (sublane padded)
            + 3 * kv_block * q_block * 4     # per-head s / p temporaries
        )
        if vmem <= budget:
            best = bh
    return best


def qkv_attention_legacy(qkv, n_heads, *, head_block=None, kv_block=None, q_block=None):
    """qkv: [N, H*3*C, T]. Returns [N, H*C, T] float32 (matches the PyTorch module)."""
    bs, width, length = qkv.shape
    assert width % (3 * n_heads) == 0
    ch = width // (3 * n_heads)

    # The PyTorch module computes attention in half precision (qkv.half()); on
    # TPU we use bf16 (native MXU dtype, same HBM/DMA bytes).  The reshape to
    # [N, 3, H, C, T] is metadata-only, so q/k/v are read straight out of ONE
    # shared copy via three BlockSpecs (no sliced/transposed copies in HBM).
    qkv16 = qkv.astype(jnp.bfloat16).reshape(bs, 3, n_heads, ch, length)

    if kv_block is None:
        kv_block = _choose_kv_block(length)
    assert kv_block == length or (kv_block % 128 == 0 and length % kv_block == 0)
    num_kv = length // kv_block

    if q_block is None:
        q_block = _choose_q_block(length)
    assert q_block == length or (q_block % 128 == 0 and length % q_block == 0)
    num_q = length // q_block

    cap = _vmem_capacity_bytes()
    vmem_limit = max(32 * 1024 * 1024, min((cap * 3) // 4, 96 * 1024 * 1024))
    budget = (vmem_limit * 3) // 4     # headroom for compiler-internal scratch

    if head_block is None:
        # Keep >= 2 parallel grid iterations so both v7x TensorCores get work.
        max_bh = n_heads if bs * num_q >= 2 else max(1, n_heads // 2)
        head_block = _choose_head_block(n_heads, ch, q_block, kv_block, budget, max_bh)
    assert n_heads % head_block == 0
    bh = head_block

    scale = 1.0 / math.sqrt(ch)   # == (ch ** -0.25) applied to both q and k
    kernel = functools.partial(_attn_kernel, scale=scale)
    grid = (bs, n_heads // bh, num_q, num_kv)

    cost = pl.CostEstimate(
        flops=4 * bs * n_heads * ch * length * length,
        transcendentals=bs * n_heads * length * length,
        bytes_accessed=(bs * 3 * n_heads * ch * length * 2 * max(1, num_q)
                        + bs * n_heads * ch * length * 4),
    )

    out = pl.pallas_call(
        kernel,
        out_shape=jax.ShapeDtypeStruct((bs, n_heads, ch, length), jnp.float32),
        grid_spec=pltpu.PrefetchScalarGridSpec(
            num_scalar_prefetch=0,
            grid=grid,
            in_specs=[
                # q / k / v indexed out of the shared qkv tensor (same array
                # passed three times, different planes of the `three` axis).
                pl.BlockSpec((None, None, bh, ch, q_block),
                             lambda b, h, t, s: (b, 0, h, 0, t)),
                pl.BlockSpec((None, None, bh, ch, kv_block),
                             lambda b, h, t, s: (b, 1, h, 0, s)),
                pl.BlockSpec((None, None, bh, ch, kv_block),
                             lambda b, h, t, s: (b, 2, h, 0, s)),
            ],
            # Output block ignores the kv axis -> resident accumulator.
            out_specs=pl.BlockSpec((None, bh, ch, q_block),
                                   lambda b, h, t, s: (b, h, 0, t)),
            scratch_shapes=[
                pltpu.VMEM((bh, 1, q_block), jnp.float32),    # running max
                pltpu.VMEM((bh, 1, q_block), jnp.float32),    # running sum
                pltpu.VMEM((bh, ch, q_block), jnp.bfloat16),  # pre-scaled q
            ],
        ),
        compiler_params=pltpu.CompilerParams(
            dimension_semantics=("parallel", "parallel", "parallel", "arbitrary"),
            vmem_limit_bytes=vmem_limit,
        ),
        cost_estimate=cost,
    )(qkv16, qkv16, qkv16)

    # [N, H, C, T] -> [N, H*C, T] (metadata-only reshape).
    return out.reshape(bs, n_heads * ch, length)


def _reference(qkv, n_heads):
    """Pure-JAX reference mirroring the PyTorch forward.

    The module uses fp16; the TPU kernel uses bf16 as its half-precision dtype,
    so the reference quantizes inputs to bf16 and does the math in f32.
    """
    bs, width, length = qkv.shape
    ch = width // (3 * n_heads)
    x = qkv.astype(jnp.bfloat16).astype(jnp.float32)
    x = x.reshape(bs, 3, n_heads, ch, length)
    q = x[:, 0].reshape(bs * n_heads, ch, length)
    k = x[:, 1].reshape(bs * n_heads, ch, length)
    v = x[:, 2].reshape(bs * n_heads, ch, length)
    scale = 1.0 / math.sqrt(math.sqrt(ch))
    w = jnp.einsum("bct,bcs->bts", q * scale, k * scale)
    w = jax.nn.softmax(w, axis=-1)
    a = jnp.einsum("bts,bcs->bct", w, v)
    return a.reshape(bs, -1, length).astype(jnp.float32)


def _check(out, ref, shape):
    assert out.shape == shape, out.shape
    assert out.dtype == jnp.float32, out.dtype
    # bf16 quantization of the scaled q and of the softmax weights (and the
    # approximate EUP reciprocal) bound the error well below 3e-2.
    assert jnp.allclose(out, ref, atol=3e-2, rtol=3e-2), float(
        jnp.max(jnp.abs(out - ref))
    )


if __name__ == "__main__":
    key = jax.random.PRNGKey(0)
    k1, k2, k3 = jax.random.split(key, 3)

    # Case 1: tiny smoke shape from the module spec.
    n_heads, ch, length, bs = 2, 16, 8, 2
    width = 3 * n_heads * ch  # 96
    qkv = jax.random.normal(k1, (bs, width, length), dtype=jnp.float32)
    out = jax.block_until_ready(qkv_attention_legacy(qkv, n_heads))
    _check(out, _reference(qkv, n_heads), (bs, n_heads * ch, length))

    # Case 2: exercises head blocking, query tiling and multi-chunk online softmax.
    n_heads, ch, length, bs = 4, 32, 256, 1
    width = 3 * n_heads * ch  # 384
    qkv = jax.random.normal(k2, (bs, width, length), dtype=jnp.float32)
    out = jax.block_until_ready(
        qkv_attention_legacy(qkv, n_heads, kv_block=128, q_block=128))
    _check(out, _reference(qkv, n_heads), (bs, n_heads * ch, length))

    # Case 3: bs=1, single q tile -> head_block is capped so >=2 parallel iters.
    n_heads, ch, length, bs = 2, 16, 64, 1
    width = 3 * n_heads * ch  # 96
    qkv = jax.random.normal(k3, (bs, width, length), dtype=jnp.float32)
    out = jax.block_until_ready(qkv_attention_legacy(qkv, n_heads))
    _check(out, _reference(qkv, n_heads), (bs, n_heads * ch, length))

    print("KERNEL_OK")
</pallas_src>

<mosaic_0001>
module attributes {stable_mosaic.version = 11 : i64} {
  func.func @_attn_kernel(%arg0: i32, %arg1: i32, %arg2: i32, %arg3: i32, %arg4: memref<1x1x2x16x8xbf16, #tpu.memory_space<vmem>>, %arg5: memref<1x1x2x16x8xbf16, #tpu.memory_space<vmem>>, %arg6: memref<1x1x2x16x8xbf16, #tpu.memory_space<vmem>>, %arg7: memref<1x2x16x8xf32, #tpu.memory_space<vmem>>, %arg8: memref<2x1x8xf32, #tpu.memory_space<vmem>>, %arg9: memref<2x1x8xf32, #tpu.memory_space<vmem>>, %arg10: memref<2x16x8xbf16, #tpu.memory_space<vmem>>) attributes {dimension_semantics = [#tpu.dimension_semantics<parallel>, #tpu.dimension_semantics<parallel>, #tpu.dimension_semantics<parallel>, #tpu.dimension_semantics<arbitrary>], iteration_bounds = array<i64: 2, 1, 1, 1>, scalar_prefetch = 0 : i64, scratch_operands = 3 : i64, tpu.core_type = #tpu.core_type<tc>, window_params = [{transform_indices = @transform_0, window_bounds = array<i64: 1, 1, 2, 16, 8>}, {transform_indices = @transform_1, window_bounds = array<i64: 1, 1, 2, 16, 8>}, {transform_indices = @transform_2, window_bounds = array<i64: 1, 1, 2, 16, 8>}, {transform_indices = @transform_3, window_bounds = array<i64: 1, 2, 16, 8>}]} {
    %c0_i32 = arith.constant 0 : i32
    %0 = arith.cmpi eq, %arg3, %c0_i32 : i32
    %1 = arith.extui %0 : i1 to i32
    %c0_i32_0 = arith.constant 0 : i32
    %2 = arith.cmpi ne, %1, %c0_i32_0 : i32
    scf.if %2 {
      %cst = arith.constant 0xFF800000 : f32
      %7 = vector.broadcast %cst : f32 to vector<2x1x8xf32>
      %c0 = arith.constant 0 : index
      %c0_5 = arith.constant 0 : index
      %c0_6 = arith.constant 0 : index
      %8 = vector.load %arg8[%c0, %c0_5, %c0_6] : memref<2x1x8xf32, #tpu.memory_space<vmem>>, vector<2x1x8xf32>
      tpu.vector_store %arg8[%c0, %c0_5, %c0_6], %7 {strides = array<i32>} : memref<2x1x8xf32, #tpu.memory_space<vmem>>, vector<2x1x8xf32>,
      %cst_7 = arith.constant 0.000000e+00 : f32
      %9 = vector.broadcast %cst_7 : f32 to vector<2x1x8xf32>
      %c0_8 = arith.constant 0 : index
      %c0_9 = arith.constant 0 : index
      %c0_10 = arith.constant 0 : index
      %10 = vector.load %arg9[%c0_8, %c0_9, %c0_10] : memref<2x1x8xf32, #tpu.memory_space<vmem>>, vector<2x1x8xf32>
      tpu.vector_store %arg9[%c0_8, %c0_9, %c0_10], %9 {strides = array<i32>} : memref<2x1x8xf32, #tpu.memory_space<vmem>>, vector<2x1x8xf32>,
      %cst_11 = arith.constant 0.000000e+00 : f32
      %11 = vector.broadcast %cst_11 : f32 to vector<2x16x8xf32>
      %c0_12 = arith.constant 0 : index
      %c0_13 = arith.constant 0 : index
      %c0_14 = arith.constant 0 : index
      %c0_15 = arith.constant 0 : index
      %12 = vector.load %arg7[%c0_12, %c0_13, %c0_14, %c0_15] : memref<1x2x16x8xf32, #tpu.memory_space<vmem>>, vector<1x2x16x8xf32>
      %13 = vector.shape_cast %12 : vector<1x2x16x8xf32> to vector<2x16x8xf32>
      %14 = vector.shape_cast %11 : vector<2x16x8xf32> to vector<1x2x16x8xf32>
      tpu.vector_store %arg7[%c0_12, %c0_13, %c0_14, %c0_15], %14 {strides = array<i32>} : memref<1x2x16x8xf32, #tpu.memory_space<vmem>>, vector<1x2x16x8xf32>,
      %c0_16 = arith.constant 0 : index
      %c0_17 = arith.constant 0 : index
      %c0_18 = arith.constant 0 : index
      %c0_19 = arith.constant 0 : index
      %c0_20 = arith.constant 0 : index
      %15 = vector.load %arg4[%c0_16, %c0_17, %c0_18, %c0_19, %c0_20] : memref<1x1x2x16x8xbf16, #tpu.memory_space<vmem>>, vector<1x1x2x16x8xbf16>
      %16 = vector.shape_cast %15 : vector<1x1x2x16x8xbf16> to vector<2x16x8xbf16>
      %17 = arith.extf %16 : vector<2x16x8xbf16> to vector<2x16x8xf32>
      %cst_21 = arith.constant 2.500000e-01 : f32
      %18 = vector.broadcast %cst_21 : f32 to vector<2x16x8xf32>
      %19 = arith.mulf %17, %18 : vector<2x16x8xf32>
      %20 = arith.truncf %19 : vector<2x16x8xf32> to vector<2x16x8xbf16>
      %c0_22 = arith.constant 0 : index
      %c0_23 = arith.constant 0 : index
      %c0_24 = arith.constant 0 : index
      %21 = vector.load %arg10[%c0_22, %c0_23, %c0_24] : memref<2x16x8xbf16, #tpu.memory_space<vmem>>, vector<2x16x8xbf16>
      tpu.vector_store %arg10[%c0_22, %c0_23, %c0_24], %20 {strides = array<i32>} : memref<2x16x8xbf16, #tpu.memory_space<vmem>>, vector<2x16x8xbf16>,
    } else {
    }
    %c0_i32_1 = arith.constant 0 : i32
    %c2_i32 = arith.constant 2 : i32
    %3 = arith.addi %c0_i32_1, %c2_i32 : i32
    %c1_i32 = arith.constant 1 : i32
    scf.for %arg11 = %c0_i32_1 to %3 step %c1_i32  : i32 {
      %7 = arith.index_cast %arg11 : i32 to index
      %c0 = arith.constant 0 : index
      %c0_5 = arith.constant 0 : index
      %8 = vector.load %arg10[%7, %c0, %c0_5] : memref<2x16x8xbf16, #tpu.memory_space<vmem>>, vector<1x16x8xbf16>
      %9 = vector.shape_cast %8 : vector<1x16x8xbf16> to vector<16x8xbf16>
      %c0_6 = arith.constant 0 : index
      %c0_7 = arith.constant 0 : index
      %10 = arith.index_cast %arg11 : i32 to index
      %c0_8 = arith.constant 0 : index
      %c0_9 = arith.constant 0 : index
      %11 = vector.load %arg5[%c0_6, %c0_7, %10, %c0_8, %c0_9] : memref<1x1x2x16x8xbf16, #tpu.memory_space<vmem>>, vector<1x1x1x16x8xbf16>
      %12 = vector.shape_cast %11 : vector<1x1x1x16x8xbf16> to vector<16x8xbf16>
      %c0_10 = arith.constant 0 : index
      %c0_11 = arith.constant 0 : index
      %13 = arith.index_cast %arg11 : i32 to index
      %c0_12 = arith.constant 0 : index
      %c0_13 = arith.constant 0 : index
      %14 = vector.load %arg6[%c0_10, %c0_11, %13, %c0_12, %c0_13] : memref<1x1x2x16x8xbf16, #tpu.memory_space<vmem>>, vector<1x1x1x16x8xbf16>
      %15 = vector.shape_cast %14 : vector<1x1x1x16x8xbf16> to vector<16x8xbf16>
      %cst = arith.constant dense<0.000000e+00> : vector<8x8xf32>
      %16 = tpu.matmul %12, %9, %cst {dimension_numbers = #tpu.dot_dimension_numbers<[0], [0], [1], [1], [0, 1, 1, 1], [], []>} : vector<16x8xbf16>, vector<16x8xbf16>, vector<8x8xf32> -> vector<8x8xf32>
      %17 = arith.index_cast %arg11 : i32 to index
      %c0_14 = arith.constant 0 : index
      %c0_15 = arith.constant 0 : index
      %18 = vector.load %arg8[%17, %c0_14, %c0_15] : memref<2x1x8xf32, #tpu.memory_space<vmem>>, vector<1x1x8xf32>
      %19 = vector.shape_cast %18 : vector<1x1x8xf32> to vector<1x8xf32>
      %20 = arith.index_cast %arg11 : i32 to index
      %c0_16 = arith.constant 0 : index
      %c0_17 = arith.constant 0 : index
      %21 = vector.load %arg9[%20, %c0_16, %c0_17] : memref<2x1x8xf32, #tpu.memory_space<vmem>>, vector<1x1x8xf32>
      %22 = vector.shape_cast %21 : vector<1x1x8xf32> to vector<1x8xf32>
      %cst_18 = arith.constant dense<0xFF800000> : vector<8xf32>
      %23 = vector.multi_reduction <maximumf>, %16, %cst_18 [0] : vector<8x8xf32> to vector<8xf32>
      %24 = vector.shape_cast %23 : vector<8xf32> to vector<1x8xf32>
      %25 = arith.maximumf %19, %24 : vector<1x8xf32>
      %26 = arith.subf %19, %25 : vector<1x8xf32>
      %27 = math.exp %26 : vector<1x8xf32>
      %28 = vector.broadcast %25 : vector<1x8xf32> to vector<8x8xf32>
      %29 = arith.subf %16, %28 : vector<8x8xf32>
      %30 = math.exp %29 : vector<8x8xf32>
      %31 = arith.mulf %27, %22 : vector<1x8xf32>
      %cst_19 = arith.constant dense<0.000000e+00> : vector<8xf32>
      %32 = vector.multi_reduction <add>, %30, %cst_19 [0] : vector<8x8xf32> to vector<8xf32>
      %33 = vector.shape_cast %32 : vector<8xf32> to vector<1x8xf32>
      %34 = arith.addf %31, %33 : vector<1x8xf32>
      %35 = arith.index_cast %arg11 : i32 to index
      %c0_20 = arith.constant 0 : index
      %c0_21 = arith.constant 0 : index
      %36 = vector.load %arg9[%35, %c0_20, %c0_21] : memref<2x1x8xf32, #tpu.memory_space<vmem>>, vector<1x1x8xf32>
      %37 = vector.shape_cast %36 : vector<1x1x8xf32> to vector<1x8xf32>
      %38 = vector.shape_cast %34 : vector<1x8xf32> to vector<1x1x8xf32>
      tpu.vector_store %arg9[%35, %c0_20, %c0_21], %38 {strides = array<i32>} : memref<2x1x8xf32, #tpu.memory_space<vmem>>, vector<1x1x8xf32>,
      %39 = arith.truncf %30 : vector<8x8xf32> to vector<8x8xbf16>
      %cst_22 = arith.constant dense<0.000000e+00> : vector<16x8xf32>
      %40 = tpu.matmul %15, %39, %cst_22 {dimension_numbers = #tpu.dot_dimension_numbers<[1], [0], [0], [1], [0, 0, 1, 1], [], []>} : vector<16x8xbf16>, vector<8x8xbf16>, vector<16x8xf32> -> vector<16x8xf32>
      %c0_23 = arith.constant 0 : index
      %41 = arith.index_cast %arg11 : i32 to index
      %c0_24 = arith.constant 0 : index
      %c0_25 = arith.constant 0 : index
      %42 = vector.load %arg7[%c0_23, %41, %c0_24, %c0_25] : memref<1x2x16x8xf32, #tpu.memory_space<vmem>>, vector<1x1x16x8xf32>
      %43 = vector.shape_cast %42 : vector<1x1x16x8xf32> to vector<16x8xf32>
      %44 = vector.broadcast %27 : vector<1x8xf32> to vector<16x8xf32>
      %45 = arith.mulf %43, %44 : vector<16x8xf32>
      %46 = arith.addf %45, %40 : vector<16x8xf32>
      %c0_26 = arith.constant 0 : index
      %47 = arith.index_cast %arg11 : i32 to index
      %c0_27 = arith.constant 0 : index
      %c0_28 = arith.constant 0 : index
      %48 = vector.load %arg7[%c0_26, %47, %c0_27, %c0_28] : memref<1x2x16x8xf32, #tpu.memory_space<vmem>>, vector<1x1x16x8xf32>
      %49 = vector.shape_cast %48 : vector<1x1x16x8xf32> to vector<16x8xf32>
      %50 = vector.shape_cast %46 : vector<16x8xf32> to vector<1x1x16x8xf32>
      tpu.vector_store %arg7[%c0_26, %47, %c0_27, %c0_28], %50 {strides = array<i32>} : memref<1x2x16x8xf32, #tpu.memory_space<vmem>>, vector<1x1x16x8xf32>,
      %51 = arith.index_cast %arg11 : i32 to index
      %c0_29 = arith.constant 0 : index
      %c0_30 = arith.constant 0 : index
      %52 = vector.load %arg8[%51, %c0_29, %c0_30] : memref<2x1x8xf32, #tpu.memory_space<vmem>>, vector<1x1x8xf32>
      %53 = vector.shape_cast %52 : vector<1x1x8xf32> to vector<1x8xf32>
      %54 = vector.shape_cast %25 : vector<1x8xf32> to vector<1x1x8xf32>
      tpu.vector_store %arg8[%51, %c0_29, %c0_30], %54 {strides = array<i32>} : memref<2x1x8xf32, #tpu.memory_space<vmem>>, vector<1x1x8xf32>,
    }
    %c2_i32_2 = arith.constant 2 : i32
    %c0_i32_3 = arith.constant 0 : i32
    %4 = arith.cmpi eq, %arg3, %c0_i32_3 : i32
    %5 = arith.extui %4 : i1 to i32
    %c0_i32_4 = arith.constant 0 : i32
    %6 = arith.cmpi ne, %5, %c0_i32_4 : i32
    scf.if %6 {
      %c0 = arith.constant 0 : index
      %c0_5 = arith.constant 0 : index
      %c0_6 = arith.constant 0 : index
      %7 = vector.load %arg9[%c0, %c0_5, %c0_6] : memref<2x1x8xf32, #tpu.memory_space<vmem>>, vector<2x1x8xf32>
      %8 = tpu.reciprocal %7 {approx = true} : vector<2x1x8xf32> -> vector<2x1x8xf32>
      %c0_7 = arith.constant 0 : index
      %c0_8 = arith.constant 0 : index
      %c0_9 = arith.constant 0 : index
      %c0_10 = arith.constant 0 : index
      %9 = vector.load %arg7[%c0_7, %c0_8, %c0_9, %c0_10] : memref<1x2x16x8xf32, #tpu.memory_space<vmem>>, vector<1x2x16x8xf32>
      %10 = vector.shape_cast %9 : vector<1x2x16x8xf32> to vector<2x16x8xf32>
      %11 = vector.broadcast %8 : vector<2x1x8xf32> to vector<2x16x8xf32>
      %12 = arith.mulf %10, %11 : vector<2x16x8xf32>
      %c0_11 = arith.constant 0 : index
      %c0_12 = arith.constant 0 : index
      %c0_13 = arith.constant 0 : index
      %c0_14 = arith.constant 0 : index
      %13 = vector.load %arg7[%c0_11, %c0_12, %c0_13, %c0_14] : memref<1x2x16x8xf32, #tpu.memory_space<vmem>>, vector<1x2x16x8xf32>
      %14 = vector.shape_cast %13 : vector<1x2x16x8xf32> to vector<2x16x8xf32>
      %15 = vector.shape_cast %12 : vector<2x16x8xf32> to vector<1x2x16x8xf32>
      tpu.vector_store %arg7[%c0_11, %c0_12, %c0_13, %c0_14], %15 {strides = array<i32>} : memref<1x2x16x8xf32, #tpu.memory_space<vmem>>, vector<1x2x16x8xf32>,
    } else {
    }
    return
  }
  func.func @transform_0(%arg0: i32, %arg1: i32, %arg2: i32, %arg3: i32) -> (i32, i32, i32, i32, i32) {
    %c0_i32 = arith.constant 0 : i32
    %c0_i32_0 = arith.constant 0 : i32
    %c0_i32_1 = arith.constant 0 : i32
    return %arg0, %c0_i32, %arg1, %c0_i32_0, %arg2 : i32, i32, i32, i32, i32
  }
  func.func @transform_1(%arg0: i32, %arg1: i32, %arg2: i32, %arg3: i32) -> (i32, i32, i32, i32, i32) {
    %c1_i32 = arith.constant 1 : i32
    %c0_i32 = arith.constant 0 : i32
    %c0_i32_0 = arith.constant 0 : i32
    return %arg0, %c1_i32, %arg1, %c0_i32, %arg3 : i32, i32, i32, i32, i32
  }
  func.func @transform_2(%arg0: i32, %arg1: i32, %arg2: i32, %arg3: i32) -> (i32, i32, i32, i32, i32) {
    %c2_i32 = arith.constant 2 : i32
    %c0_i32 = arith.constant 0 : i32
    %c0_i32_0 = arith.constant 0 : i32
    return %arg0, %c2_i32, %arg1, %c0_i32, %arg3 : i32, i32, i32, i32, i32
  }
  func.func @transform_3(%arg0: i32, %arg1: i32, %arg2: i32, %arg3: i32) -> (i32, i32, i32, i32) {
    %c0_i32 = arith.constant 0 : i32
    %c0_i32_0 = arith.constant 0 : i32
    return %arg0, %arg1, %c0_i32, %arg2 : i32, i32, i32, i32
  }
}

</mosaic_0001>

<bundles_post_ra>
// kernel: tpu_custom_call.1
= control target key start
LH: loop header
LB: loop body
LE: loop exit
PB: predicated region body
PF: predicated region fallthrough
CT: control target
= control target key end

     0   :  { %s948_s12 = smov 0   ;;  %s950_s13 = smov 0   ;;  %s1053_s0 = inlined_call_operand.vmem [shape: bf16[2,3,2,16,8], index: 0, kind: input, shape index: {}]   ;;  %s1054_s1 = inlined_call_operand.vmem [shape: bf16[2,3,2,16,8], index: 1, kind: input, shape index: {}]   ;;  %s1055_s2 = inlined_call_operand.vmem [shape: bf16[2,3,2,16,8], index: 2, kind: input, shape index: {}]   ;;  %s1056_s3 = inlined_call_operand.vmem [shape: f32[2,2,16,8], index: 3, kind: output, shape index: {}]  }
   0x1   :  { %s952_s14 = smov 0  }
   0x2 LB: > { %s39_s15 = sadd.s32 1, %s914_s13  ;;  %p798_p0 = scmp.ge.s32.totalorder %s918_s14, 1  ;;  %s918_s14 = sphi %s952_s14, %s13_s14   ;;  %s914_s13 = sphi %s950_s13, %s1058_s13   ;;  %s910_s12 = sphi %s948_s12, %s1057_s12  }
   0x3   : > { %p41_p1 = scmp.ge.s32.totalorder %s39_s15, 2  ;;  %p228_p2 = scmp.lt.s32.totalorder %s918_s14, 3 }
   0x5   : > { %s1060_s15 = smov (%p41_p1, %s39_s15), 0  ;;  %p229_p3 = pnand %p798_p0, %p228_p2 }
   0x6   : > { %vm359_vm0 = vcmask (!%p229_p3), 57344   ;;  %p297_p4 = scmp.lt.s32.totalorder (!%p229_p3), %s910_s12, 1  ;;  %v924_v0 = vmov (!%p229_p3), -inf   ;;  %v925_v1 = vmov (!%p229_p3), 0.0   ;;  %vm364_vm1 = vcmask (!%p229_p3), 64512   ;;  %s999_s30 = smov (!%p229_p3), 0  }
   0x7   : > { %232 = sbr.rel (%p229_p3) target bundleno = 611 (0x263), region = 32  ;;  %360 = vst.msk [vmem:[#allocation2] sm:$0x1] (!%p229_p3), %vm359_vm0, %v924_v0  ;;  %361 = vst.msk [vmem:[#allocation2 + $0x1] sm:$0x1] (!%p229_p3), %vm359_vm0, %v924_v0 }
   0x8   : > { %362 = vst.msk [vmem:[#allocation3] sm:$0x1] (!%p229_p3), %vm359_vm0, %v925_v1  ;;  %363 = vst.msk [vmem:[#allocation3 + $0x1] sm:$0x1] (!%p229_p3), %vm359_vm0, %v925_v1 }
   0xe   : > { %s1062_s12 = smov (!%p297_p4, %s910_s12), 1 }
   0xf   : > { %s970_s16 = smul.u32 48, %s1062_s12  ;;  %s818_s17 = sshll.u32 %s1062_s12, 5 }
  0x10   : > { %s975_s20 = scalar_lea.vmem %s1056_s3, %s818_s17 }
  0x11   : > { %s703_s23 = scalar_lea.vmem %s1054_s1, %s970_s16  ;;  %s710_s26 = scalar_lea.vmem %s1055_s2, %s970_s16  ;;  %365 = vst.msk [vmem:[%s975_s20] sm:$0xff] %vm364_vm1, %v925_v1  ;;  %366 = vst.msk [vmem:[%s975_s20 + $0x8] sm:$0xff] %vm364_vm1, %v925_v1 }
  0x12   : > { %367 = vst.msk [vmem:[%s975_s20 + $0x10] sm:$0xff] %vm364_vm1, %v925_v1  ;;  %368 = vst.msk [vmem:[%s975_s20 + $0x18] sm:$0xff] %vm364_vm1, %v925_v1  ;;  %s308_s29 = scalar_lea.vmem %s1053_s0, %s970_s16 }
  0x13   : > { %v820_v2 = vld [vmem:[%s308_s29] sm:$0xff]   ;;  %v827_v3 = vld [vmem:[%s308_s29 + $0x8] sm:$0xff]  }
  0x14   : > { %v821_v4 = vunpack.c.l.bf16 %v820_v2  ;;  %v822_v5 = vunpack.c.h.bf16 %v820_v2  ;;  %v825_v6 = vunpack.c.l.bf16 %v827_v3  ;;  %v826_v7 = vunpack.c.h.bf16 %v827_v3 }
  0x16   : > { %v377_v8 = vmul.f32 0.25, %v821_v4  ;;  %v378_v9 = vmul.f32 0.25, %v822_v5  ;;  %v379_v10 = vmul.f32 0.25, %v825_v6  ;;  %v380_v11 = vmul.f32 0.25, %v826_v7 }
  0x18   : > { %v381_v12 = vpack.c.bf16 %v378_v9, %v377_v8  ;;  %v382_v13 = vpack.c.bf16 %v380_v11, %v379_v10 }
  0x1a   : > { %383 = vst.msk [vmem:[#allocation4] sm:$0xff] %vm364_vm1, %v381_v12  ;;  %384 = vst.msk [vmem:[#allocation4 + $0x8] sm:$0xff] %vm364_vm1, %v382_v13 }
  0x1b LB: >> { %v926_v14 = vmov 0.0   ;;  %vm927_vm2 = vmmov 0   ;;  %s804_s4 = sshll.u32 %s922_s30, 3  ;;  %vm425_vm3 = vcmask 130048   ;;  %v486_v25 = vlaneseq  ;;  %s469_s12 = scalar_lea.vmem [#allocation2], %s922_s30  ;;  %s922_s30 = sphi %s999_s30, %s390_s30  }
  0x1c   : >> { %832 = vmatprep.subr.bf16.mxu0 %v926_v14  ;;  %834 = vmatprep.mubr.msk.bf16.mxu0 %vm927_vm2, %v926_v14  ;;  %s721_s7 = scalar_lea.vmem %s703_s23, %s804_s4  ;;  %s392_s8 = scalar_lea.vmem [#allocation4], %s804_s4  ;;  %v470_v30 = vld [vmem:[%s469_s12] sm:$0x1]  ;;  %vm514_vm4 = vcmask 1043456  }
  0x1d   : >> { %838 = vmatprep.subr.bf16.mxu1 %v926_v14  ;;  %840 = vmatprep.mubr.msk.bf16.mxu1 %vm927_vm2, %v926_v14  ;;  %v882_v15 = vld [vmem:[%s721_s7 + $0x10] sm:$0xff]   ;;  %s1015_s11 = scalar_lea.vmem %s710_s26, %s804_s4  ;;  %v487_v28 = vshrl.u32 %v486_v25, 7  ;;  %s471_s17 = scalar_lea.vmem [#allocation3], %s922_s30 }
  0x1e   : >> { %409 = vxpose.xlu0.c.b16.start.end [1/1] (short) (narrow) %v882_v15, 16  ;;  %v883_v46 = vld [vmem:[%s1015_s11 + $0x20] sm:$0xff]   ;;  %s815_s18 = sshll.u32 %s922_s30, 4  ;;  %s390_s30 = sadd.s32 1, %s922_s30  }
  0x1f   : >> { %v488_v32 = vsub.s32 0, %v487_v28  ;;  %v472_v50 = vld [vmem:[%s471_s17] sm:$0x1]  ;;  %s560_s19 = scalar_lea.vmem %s975_s20, %s815_s18  ;;  %p387_p5 = scmp.ge.s32.totalorder %s390_s30, 2  }
  0x20   : >> { %v561_v55 = vld [vmem:[%s560_s19] sm:$0xff]  ;;  %v562_v56 = vld [vmem:[%s560_s19 + $0x8] sm:$0xff] }
  0x21   : >> { %v393_v16 = vld [vmem:[%s392_s8] sm:$0xff] }
  0x22   : >> { %833 = vmatpush3.bf16.msra.mxu0 %v393_v16 }
  0x84   : >> { %v417_v17 = vpop.trf.xlu0 }
  0x85   : >> { %835 = vmatmul.mubr.msk.bf16.vlgmr.msra.gmra.mrb[0].mxu0 %vm425_vm3, %v417_v17 }
 0x158   : >> { %v463_v18 = vpop.f32.mrb[0].mxu0 }
 0x159   : >> { %v474_v19 = vsel %vm364_vm1, %v463_v18, -inf  ;;  %v836_v20 = vpop.f32.mrb[1].mxu0 }
 0x15a   : >> { %v475_v21 = vrot.slane %v474_v19, 4  ;;  %v466_v22 = vpop.f32.mrb[2].mxu0 }
 0x15b   : >> { %v837_v23 = vpop.f32.mrb[3].mxu0 }
 0x15c   : >> { %v476_v24 = vmax.f32 %v474_v19, %v475_v21 }
 0x15e   : >> { %v477_v26 = vrot.slane %v476_v24, 2 }
 0x160   : >> { %v478_v27 = vmax.f32 %v476_v24, %v477_v26 }
 0x162   : >> { %v479_v29 = vrot.slane %v478_v27, 1 }
 0x164   : >> { %v480_v31 = vmax.f32 %v478_v27, %v479_v29 }
 0x166   : >> { %v481_v33 = vmax.f32 %v470_v30, %v480_v31 }
 0x168   : >> { %v482_v34 = vsub.f32 %v470_v30, %v481_v33  ;;  %v489_v35 = vrot.slane %v481_v33, %v488_v32  ;;  %575 = vst.msk [vmem:[%s469_s12] sm:$0x1] %vm359_vm0, %v481_v33 }
 0x16a   : >> { %v483_v36 = vmul.f32 1.442695, %v482_v34  ;;  %v491_v37 = vsub.f32 %v463_v18, %v489_v35 }
 0x16c   : >> { %884 = vpow2.f32 %v483_v36  ;;  %v492_v38 = vmul.f32 1.442695, %v491_v37 }
 0x16e   : >> { %886 = vpow2.f32 %v492_v38 }
 0x176   : >> { %v885_v39 = vpop.eup %884 }
 0x177   : >> { %v567_v40 = vrot.slane %v885_v39, %v488_v32  ;;  %v494_v52 = vmul.f32 %v885_v39, %v472_v50 }
 0x178   : >> { %v887_v41 = vpop.eup %886 }
 0x179   : >> { %v495_v42 = vsel %vm364_vm1, %v887_v41, 0.0  ;;  %v505_v43 = vpack.c.bf16 %v887_v41, %v887_v41  ;;  %v569_v57 = vmul.f32 %v567_v40, %v561_v55  ;;  %v570_v61 = vmul.f32 %v567_v40, %v562_v56 }
 0x17a   : >> { %v496_v44 = vrot.slane %v495_v42, 4 }
 0x17b   : >> { %v516_v45 = vsel %vm514_vm4, %v505_v43, 0 }
 0x17c   : >> { %v497_v47 = vadd.f32 %v496_v44, %v495_v42  ;;  %839 = vmatpush3.bf16.msra.mxu1 %v516_v45 }
 0x17e   : >> { %v498_v48 = vrot.slane %v497_v47, 2 }
 0x17f   : >> { %841 = vmatmul.mubr.msk.bf16.vlgmr.msra.gmra.mrb[0].mxu1 %vm364_vm1, %v883_v46 }
 0x180   : >> { %v499_v49 = vadd.f32 %v498_v48, %v497_v47 }
 0x182   : >> { %v500_v51 = vrot.slane %v499_v49, 1 }
 0x184   : >> { %v501_v53 = vadd.f32 %v500_v51, %v499_v49 }
 0x186   : >> { %v502_v54 = vadd.f32 %v501_v53, %v494_v52 }
 0x188   : >> { %504 = vst.msk [vmem:[%s471_s17] sm:$0x1] %vm359_vm0, %v502_v54 }
 0x18f   : > { %v579_v1 = vld [vmem:[#allocation3] sm:$0x1] (%p387_p5)  ;;  %v580_v2 = vld [vmem:[#allocation3 + $0x1] sm:$0x1] (%p387_p5) }
 0x190   : > { %888 = vrcp.f32 (%p387_p5), %v579_v1 }
 0x191   : > { %890 = vrcp.f32 (%p387_p5), %v580_v2 }
 0x19a   : > { %v889_v3 = vpop.eup (%p387_p5), %888 }
 0x19b   : > { %v891_v6 = vpop.eup (%p387_p5), %890  ;;  %v592_v7 = vrot.slane (%p387_p5), %v889_v3, %v488_v32 }
 0x19c   : > { %v596_v10 = vrot.slane (%p387_p5), %v891_v6, %v488_v32 }
 0x251   : > { %389 = sbr.rel (!%p387_p5) target bundleno = 27 (0x1b), region = 89 }
 0x252   : >> { %v552_v58 = vpop.f32.mrb[0].mxu1 }
 0x253   : >> { %v571_v59 = vadd.f32 %v569_v57, %v552_v58  ;;  %v842_v60 = vpop.f32.mrb[1].mxu1 }
 0x254   : >> { %v555_v62 = vpop.f32.mrb[2].mxu1 }
 0x255   : >> { %573 = vst.msk [vmem:[%s560_s19] sm:$0xff] %vm364_vm1, %v571_v59  ;;  %v572_v63 = vadd.f32 %v570_v61, %v555_v62  ;;  %v843_v0 = vpop.f32.mrb[3].mxu1 }
 0x257   : >> { %574 = vst.msk [vmem:[%s560_s19 + $0x8] sm:$0xff] %vm364_vm1, %v572_v63 }
 0x25e   : > { %v583_v4 = vld [vmem:[%s975_s20] sm:$0xff]  ;;  %v584_v5 = vld [vmem:[%s975_s20 + $0x8] sm:$0xff]  ;;  %v585_v8 = vld [vmem:[%s975_s20 + $0x10] sm:$0xff] }
 0x25f   : > { %v586_v9 = vld [vmem:[%s975_s20 + $0x18] sm:$0xff]  ;;  %v599_v11 = vmul.f32 %v592_v7, %v583_v4  ;;  %v600_v12 = vmul.f32 %v592_v7, %v584_v5  ;;  %v601_v13 = vmul.f32 %v596_v10, %v585_v8 }
 0x260   : > { %v602_v14 = vmul.f32 %v596_v10, %v586_v9 }
 0x261   : > { %604 = vst.msk [vmem:[%s975_s20] sm:$0xff] %vm364_vm1, %v599_v11  ;;  %605 = vst.msk [vmem:[%s975_s20 + $0x8] sm:$0xff] %vm364_vm1, %v600_v12 }
 0x262   : > { %606 = vst.msk [vmem:[%s975_s20 + $0x10] sm:$0xff] %vm364_vm1, %v601_v13  ;;  %607 = vst.msk [vmem:[%s975_s20 + $0x18] sm:$0xff] %vm364_vm1, %v602_v14 }
 0x263 PF: > { %s13_s14 = sadd.s32 1, %s918_s14   ;;  %s1057_s12 = smov %s914_s13 }
 0x264   : > { %p10_p6 = scmp.ge.s32.totalorder %s13_s14, 4   ;;  %s1058_s13 = smov %s1060_s15 }
 0x266   :  { %12 = sbr.rel (!%p10_p6) target bundleno = 2 (0x2), region = 100 }

</bundles_post_ra>
